<compile_context>
chip_gen: v5e
topology: v5e:2x2
jax: 0.10.0
libtpu: 0.0.40
codegen_flags: <defaults>
</compile_context>

<pallas_src>
import functools

import jax
import jax.numpy as jnp
from jax import lax
from jax.experimental import pallas as pl
from jax.experimental.pallas import tpu as pltpu

LN_EPS = 1e-5  # nn.LayerNorm default eps


# --------------------------------------------------------------------------
# Fused kernel: LayerNorm -> fused left|right proj -> outer mean -> proj_out
# --------------------------------------------------------------------------
def _outer_mean_kernel(*refs, eps, use_mask, mxu_dtype):
    if use_mask:
        (x_ref, mask_ref, g_ref, beta_ref, wlr_ref, blr_ref,
         wo_ref, bo_ref, o_ref) = refs
    else:
        (x_ref, g_ref, beta_ref, wlr_ref, blr_ref,
         wo_ref, bo_ref, o_ref) = refs
        mask_ref = None

    x = x_ref[0]                                    # (M, N, D)
    M, N, D = x.shape
    H = wo_ref.shape[0]

    # ---- LayerNorm over the feature dim (f32) ----
    mu = jnp.mean(x, axis=-1, keepdims=True)
    xc = x - mu
    var = jnp.mean(xc * xc, axis=-1, keepdims=True)
    xn = xc * lax.rsqrt(var + LN_EPS) * g_ref[...] + beta_ref[...]

    # ---- fused left|right projection: one (M*N, D) @ (D, 2H) matmul ----
    lr = jnp.dot(xn.reshape(M * N, D).astype(mxu_dtype),
                 wlr_ref[...].astype(mxu_dtype),
                 preferred_element_type=jnp.float32) + blr_ref[...]
    lr = lr.reshape(M, N, 2 * H)
    left = lr[:, :, :H]                             # (M, N, H)
    right = lr[:, :, H:]                            # (M, N, H)

    if use_mask:
        m2d = mask_ref[0]                           # (M, N) float {0, 1}
        m3 = m2d[:, :, None]
        left = left * m3
        right = right * m3

    # ---- outer-product mean over m without materializing (M, N, N, H) ----
    pooled = jnp.zeros((N, N, H), jnp.float32)
    for m in range(M):                              # static, accumulates in vregs
        pooled = pooled + left[m][:, None, :] * right[m][None, :, :]

    if use_mask:
        denom = jnp.dot(m2d.T, m2d, preferred_element_type=jnp.float32)  # (N, N)
        scale = pl.reciprocal(denom + eps, approx=True) * (1.0 / M)
        pooled = pooled * scale[:, :, None]
    else:
        pooled = pooled * (1.0 / M)

    # ---- output projection, bias folded into the epilogue ----
    out = jnp.dot(pooled.reshape(N * N, H).astype(mxu_dtype),
                  wo_ref[...].astype(mxu_dtype),
                  preferred_element_type=jnp.float32) + bo_ref[...]
    o_ref[0] = out.reshape(N, N, D).astype(o_ref.dtype)


def outer_mean_forward(x, params, mask=None, *, eps=1e-5,
                       mxu_dtype=jnp.float32):
    """x: (B, M, N, D) float32; mask: optional (B, M, N) bool."""
    B, M, N, D = x.shape
    H = params["w_left"].shape[1]
    use_mask = mask is not None

    # Pack left|right projection weights once in the wrapper.
    w_lr = jnp.concatenate([params["w_left"], params["w_right"]], axis=1)   # (D, 2H)
    b_lr = jnp.concatenate([params["b_left"], params["b_right"]]).reshape(1, 2 * H)

    kernel = functools.partial(_outer_mean_kernel, eps=eps, use_mask=use_mask,
                               mxu_dtype=mxu_dtype)
    const2 = lambda b: (0, 0)

    in_specs = [pl.BlockSpec((1, M, N, D), lambda b: (b, 0, 0, 0))]          # x
    inputs = [x]
    if use_mask:
        in_specs.append(pl.BlockSpec((1, M, N), lambda b: (b, 0, 0)))        # mask
        inputs.append(mask.astype(jnp.float32))
    in_specs += [
        pl.BlockSpec((1, D), const2),          # LN gamma
        pl.BlockSpec((1, D), const2),          # LN beta
        pl.BlockSpec((D, 2 * H), const2),      # W_left|W_right
        pl.BlockSpec((1, 2 * H), const2),      # b_left|b_right
        pl.BlockSpec((H, D), const2),          # W_out
        pl.BlockSpec((1, D), const2),          # b_out
    ]
    inputs += [params["ln_g"].reshape(1, D), params["ln_b"].reshape(1, D),
               w_lr, b_lr, params["w_out"], params["b_out"].reshape(1, D)]

    # Rough per-step f32 VMEM estimate (blocks + live intermediates), with
    # headroom for double buffering; capped at 64 MiB so v7x stays safe.
    est = 4 * (M * N * D                 # x block
               + 3 * M * N * 2 * H       # lr / left / right
               + 2 * N * N * H           # pooled (+ temp)
               + 2 * N * N * D           # out value + output block
               + D * 2 * H + H * D + 4 * D + 2 * H
               + (M * N if use_mask else 0))
    vmem_limit = int(min(64 * 2**20, max(32 * 2**20, 3 * est)))

    return pl.pallas_call(
        kernel,
        out_shape=jax.ShapeDtypeStruct((B, N, N, D), x.dtype),
        grid=(B,),
        in_specs=in_specs,
        out_specs=pl.BlockSpec((1, N, N, D), lambda b: (b, 0, 0, 0)),
        compiler_params=pltpu.CompilerParams(
            dimension_semantics=("parallel",),
            vmem_limit_bytes=vmem_limit,
        ),
    )(*inputs)


# --------------------------------------------------------------------------
# Pure-JAX reference (mirrors the PyTorch module exactly)
# --------------------------------------------------------------------------
def outer_mean_ref(x, params, mask=None, eps=1e-5):
    mu = jnp.mean(x, axis=-1, keepdims=True)
    var = jnp.mean((x - mu) ** 2, axis=-1, keepdims=True)
    xn = (x - mu) / jnp.sqrt(var + LN_EPS) * params["ln_g"] + params["ln_b"]
    left = xn @ params["w_left"] + params["b_left"]
    right = xn @ params["w_right"] + params["b_right"]
    outer = left[:, :, :, None, :] * right[:, :, None, :, :]
    if mask is not None:
        pair = (mask[:, :, :, None, None] & mask[:, :, None, :, None]
                ).astype(outer.dtype)
        outer = outer * pair
        pooled = outer.mean(axis=1) / (pair.sum(axis=1) + eps)
    else:
        pooled = outer.mean(axis=1)
    return pooled @ params["w_out"] + params["b_out"]


# --------------------------------------------------------------------------
# Main
# --------------------------------------------------------------------------
if __name__ == "__main__":
    key = jax.random.PRNGKey(0)
    (k_x, k_m, k_g, k_b,
     k_wl, k_bl, k_wr, k_br, k_wo, k_bo) = jax.random.split(key, 10)

    B, M, N = 2, 4, 8    # batch, MSA rows, sequence length
    DIM = 32             # model dim
    HID = 32             # hidden_dim (defaults to dim)

    def linear_init(kw, kb, fan_in, fan_out):
        bound = 1.0 / float(fan_in) ** 0.5
        w = jax.random.uniform(kw, (fan_in, fan_out), jnp.float32, -bound, bound)
        b = jax.random.uniform(kb, (fan_out,), jnp.float32, -bound, bound)
        return w, b

    w_left, b_left = linear_init(k_wl, k_bl, DIM, HID)
    w_right, b_right = linear_init(k_wr, k_br, DIM, HID)
    w_out, b_out = linear_init(k_wo, k_bo, HID, DIM)

    params = {
        "ln_g": 1.0 + 0.1 * jax.random.normal(k_g, (DIM,), jnp.float32),
        "ln_b": 0.1 * jax.random.normal(k_b, (DIM,), jnp.float32),
        "w_left": w_left, "b_left": b_left,
        "w_right": w_right, "b_right": b_right,
        "w_out": w_out, "b_out": b_out,
    }

    x = jax.random.normal(k_x, (B, M, N, DIM), jnp.float32)
    mask = jax.random.bernoulli(k_m, 0.8, (B, M, N))

    fwd_nomask = jax.jit(lambda xx: outer_mean_forward(xx, params))
    fwd_masked = jax.jit(lambda xx, mm: outer_mean_forward(xx, params, mask=mm))
    fwd_bf16 = jax.jit(lambda xx, mm: outer_mean_forward(
        xx, params, mask=mm, mxu_dtype=jnp.bfloat16))

    out = fwd_nomask(x)
    out_m = fwd_masked(x, mask)
    out_bf16 = fwd_bf16(x, mask)
    jax.block_until_ready((out, out_m, out_bf16))

    with jax.default_matmul_precision("highest"):
        ref = outer_mean_ref(x, params, mask=None)
        ref_m = outer_mean_ref(x, params, mask=mask)

    assert out.shape == (B, N, N, DIM) and out_m.shape == (B, N, N, DIM)
    assert jnp.allclose(out, ref, atol=2e-3, rtol=2e-3), \
        float(jnp.max(jnp.abs(out - ref)))
    assert jnp.allclose(out_m, ref_m, atol=2e-3, rtol=2e-3), \
        float(jnp.max(jnp.abs(out_m - ref_m)))
    # bf16-MXU variant (v6e/v7x fast path): looser tolerance.
    assert jnp.allclose(out_bf16, ref_m, atol=5e-2, rtol=5e-2), \
        float(jnp.max(jnp.abs(out_bf16 - ref_m)))

    print("KERNEL_OK")
</pallas_src>

<mosaic_0001>
module attributes {stable_mosaic.version = 11 : i64} {
  func.func @_outer_mean_kernel(%arg0: i32, %arg1: memref<1x4x8x32xf32, #tpu.memory_space<vmem>>, %arg2: memref<1x32xf32, #tpu.memory_space<vmem>>, %arg3: memref<1x32xf32, #tpu.memory_space<vmem>>, %arg4: memref<32x64xf32, #tpu.memory_space<vmem>>, %arg5: memref<1x64xf32, #tpu.memory_space<vmem>>, %arg6: memref<32x32xf32, #tpu.memory_space<vmem>>, %arg7: memref<1x32xf32, #tpu.memory_space<vmem>>, %arg8: memref<1x8x8x32xf32, #tpu.memory_space<vmem>>) attributes {dimension_semantics = [#tpu.dimension_semantics<parallel>], iteration_bounds = array<i64: 2>, scalar_prefetch = 0 : i64, scratch_operands = 0 : i64, tpu.core_type = #tpu.core_type<tc>, window_params = [{transform_indices = @transform_0, window_bounds = array<i64: 1, 4, 8, 32>}, {pipeline_mode = #tpu.pipeline_mode<synchronous>, transform_indices = @transform_1, window_bounds = array<i64: 1, 32>}, {pipeline_mode = #tpu.pipeline_mode<synchronous>, transform_indices = @transform_2, window_bounds = array<i64: 1, 32>}, {pipeline_mode = #tpu.pipeline_mode<synchronous>, transform_indices = @transform_3, window_bounds = array<i64: 32, 64>}, {pipeline_mode = #tpu.pipeline_mode<synchronous>, transform_indices = @transform_4, window_bounds = array<i64: 1, 64>}, {pipeline_mode = #tpu.pipeline_mode<synchronous>, transform_indices = @transform_5, window_bounds = array<i64: 32, 32>}, {pipeline_mode = #tpu.pipeline_mode<synchronous>, transform_indices = @transform_6, window_bounds = array<i64: 1, 32>}, {transform_indices = @transform_7, window_bounds = array<i64: 1, 8, 8, 32>}]} {
    %c0 = arith.constant 0 : index
    %c0_0 = arith.constant 0 : index
    %c0_1 = arith.constant 0 : index
    %c0_2 = arith.constant 0 : index
    %0 = vector.load %arg1[%c0, %c0_0, %c0_1, %c0_2] : memref<1x4x8x32xf32, #tpu.memory_space<vmem>>, vector<1x4x8x32xf32>
    %1 = vector.shape_cast %0 : vector<1x4x8x32xf32> to vector<4x8x32xf32>
    %cst = arith.constant dense<0.000000e+00> : vector<4x8xf32>
    %2 = vector.multi_reduction <add>, %1, %cst [2] : vector<4x8x32xf32> to vector<4x8xf32>
    %3 = vector.shape_cast %2 : vector<4x8xf32> to vector<4x8x1xf32>
    %cst_3 = arith.constant 3.200000e+01 : f32
    %4 = vector.broadcast %cst_3 : f32 to vector<4x8x1xf32>
    %5 = arith.divf %3, %4 : vector<4x8x1xf32>
    %6 = vector.broadcast %5 : vector<4x8x1xf32> to vector<4x8x32xf32>
    %7 = arith.subf %1, %6 : vector<4x8x32xf32>
    %8 = arith.mulf %7, %7 : vector<4x8x32xf32>
    %cst_4 = arith.constant dense<0.000000e+00> : vector<4x8xf32>
    %9 = vector.multi_reduction <add>, %8, %cst_4 [2] : vector<4x8x32xf32> to vector<4x8xf32>
    %10 = vector.shape_cast %9 : vector<4x8xf32> to vector<4x8x1xf32>
    %cst_5 = arith.constant 3.200000e+01 : f32
    %11 = vector.broadcast %cst_5 : f32 to vector<4x8x1xf32>
    %12 = arith.divf %10, %11 : vector<4x8x1xf32>
    %cst_6 = arith.constant 9.99999974E-6 : f32
    %13 = vector.broadcast %cst_6 : f32 to vector<4x8x1xf32>
    %14 = arith.addf %12, %13 : vector<4x8x1xf32>
    %15 = math.rsqrt %14 : vector<4x8x1xf32>
    %16 = vector.broadcast %15 : vector<4x8x1xf32> to vector<4x8x32xf32>
    %17 = arith.mulf %7, %16 : vector<4x8x32xf32>
    %c0_7 = arith.constant 0 : index
    %c0_8 = arith.constant 0 : index
    %18 = vector.load %arg2[%c0_7, %c0_8] : memref<1x32xf32, #tpu.memory_space<vmem>>, vector<1x32xf32>
    %19 = vector.shape_cast %18 : vector<1x32xf32> to vector<1x1x32xf32>
    %20 = vector.broadcast %19 : vector<1x1x32xf32> to vector<4x8x32xf32>
    %21 = arith.mulf %17, %20 : vector<4x8x32xf32>
    %c0_9 = arith.constant 0 : index
    %c0_10 = arith.constant 0 : index
    %22 = vector.load %arg3[%c0_9, %c0_10] : memref<1x32xf32, #tpu.memory_space<vmem>>, vector<1x32xf32>
    %23 = vector.shape_cast %22 : vector<1x32xf32> to vector<1x1x32xf32>
    %24 = vector.broadcast %23 : vector<1x1x32xf32> to vector<4x8x32xf32>
    %25 = arith.addf %21, %24 : vector<4x8x32xf32>
    %26 = vector.shape_cast %25 : vector<4x8x32xf32> to vector<32x32xf32>
    %c0_11 = arith.constant 0 : index
    %c0_12 = arith.constant 0 : index
    %27 = vector.load %arg4[%c0_11, %c0_12] : memref<32x64xf32, #tpu.memory_space<vmem>>, vector<32x64xf32>
    %cst_13 = arith.constant dense<0.000000e+00> : vector<32x64xf32>
    %28 = tpu.matmul %26, %27, %cst_13 {dimension_numbers = #tpu.dot_dimension_numbers<[1], [0], [0], [1], [0, 0, 1, 1], [], []>} : vector<32x32xf32>, vector<32x64xf32>, vector<32x64xf32> -> vector<32x64xf32>
    %c0_14 = arith.constant 0 : index
    %c0_15 = arith.constant 0 : index
    %29 = vector.load %arg5[%c0_14, %c0_15] : memref<1x64xf32, #tpu.memory_space<vmem>>, vector<1x64xf32>
    %30 = vector.broadcast %29 : vector<1x64xf32> to vector<32x64xf32>
    %31 = arith.addf %28, %30 : vector<32x64xf32>
    %32 = vector.shape_cast %31 : vector<32x64xf32> to vector<4x8x64xf32>
    %33 = vector.extract_strided_slice %32 {offsets = [0, 0, 0], sizes = [4, 8, 32], strides = [1, 1, 1]} : vector<4x8x64xf32> to vector<4x8x32xf32>
    %34 = vector.extract_strided_slice %32 {offsets = [0, 0, 32], sizes = [4, 8, 32], strides = [1, 1, 1]} : vector<4x8x64xf32> to vector<4x8x32xf32>
    %cst_16 = arith.constant 0.000000e+00 : f32
    %35 = vector.broadcast %cst_16 : f32 to vector<8x8x32xf32>
    %36 = vector.extract_strided_slice %33 {offsets = [0, 0, 0], sizes = [1, 8, 32], strides = [1, 1, 1]} : vector<4x8x32xf32> to vector<1x8x32xf32>
    %37 = vector.shape_cast %36 : vector<1x8x32xf32> to vector<8x32xf32>
    %38 = vector.shape_cast %37 : vector<8x32xf32> to vector<8x1x32xf32>
    %39 = vector.extract_strided_slice %34 {offsets = [0, 0, 0], sizes = [1, 8, 32], strides = [1, 1, 1]} : vector<4x8x32xf32> to vector<1x8x32xf32>
    %40 = vector.shape_cast %39 : vector<1x8x32xf32> to vector<8x32xf32>
    %41 = vector.shape_cast %40 : vector<8x32xf32> to vector<1x8x32xf32>
    %42 = vector.broadcast %38 : vector<8x1x32xf32> to vector<8x8x32xf32>
    %43 = vector.broadcast %41 : vector<1x8x32xf32> to vector<8x8x32xf32>
    %44 = arith.mulf %42, %43 : vector<8x8x32xf32>
    %45 = arith.addf %35, %44 : vector<8x8x32xf32>
    %46 = vector.extract_strided_slice %33 {offsets = [1, 0, 0], sizes = [1, 8, 32], strides = [1, 1, 1]} : vector<4x8x32xf32> to vector<1x8x32xf32>
    %47 = vector.shape_cast %46 : vector<1x8x32xf32> to vector<8x32xf32>
    %48 = vector.shape_cast %47 : vector<8x32xf32> to vector<8x1x32xf32>
    %49 = vector.extract_strided_slice %34 {offsets = [1, 0, 0], sizes = [1, 8, 32], strides = [1, 1, 1]} : vector<4x8x32xf32> to vector<1x8x32xf32>
    %50 = vector.shape_cast %49 : vector<1x8x32xf32> to vector<8x32xf32>
    %51 = vector.shape_cast %50 : vector<8x32xf32> to vector<1x8x32xf32>
    %52 = vector.broadcast %48 : vector<8x1x32xf32> to vector<8x8x32xf32>
    %53 = vector.broadcast %51 : vector<1x8x32xf32> to vector<8x8x32xf32>
    %54 = arith.mulf %52, %53 : vector<8x8x32xf32>
    %55 = arith.addf %45, %54 : vector<8x8x32xf32>
    %56 = vector.extract_strided_slice %33 {offsets = [2, 0, 0], sizes = [1, 8, 32], strides = [1, 1, 1]} : vector<4x8x32xf32> to vector<1x8x32xf32>
    %57 = vector.shape_cast %56 : vector<1x8x32xf32> to vector<8x32xf32>
    %58 = vector.shape_cast %57 : vector<8x32xf32> to vector<8x1x32xf32>
    %59 = vector.extract_strided_slice %34 {offsets = [2, 0, 0], sizes = [1, 8, 32], strides = [1, 1, 1]} : vector<4x8x32xf32> to vector<1x8x32xf32>
    %60 = vector.shape_cast %59 : vector<1x8x32xf32> to vector<8x32xf32>
    %61 = vector.shape_cast %60 : vector<8x32xf32> to vector<1x8x32xf32>
    %62 = vector.broadcast %58 : vector<8x1x32xf32> to vector<8x8x32xf32>
    %63 = vector.broadcast %61 : vector<1x8x32xf32> to vector<8x8x32xf32>
    %64 = arith.mulf %62, %63 : vector<8x8x32xf32>
    %65 = arith.addf %55, %64 : vector<8x8x32xf32>
    %66 = vector.extract_strided_slice %33 {offsets = [3, 0, 0], sizes = [1, 8, 32], strides = [1, 1, 1]} : vector<4x8x32xf32> to vector<1x8x32xf32>
    %67 = vector.shape_cast %66 : vector<1x8x32xf32> to vector<8x32xf32>
    %68 = vector.shape_cast %67 : vector<8x32xf32> to vector<8x1x32xf32>
    %69 = vector.extract_strided_slice %34 {offsets = [3, 0, 0], sizes = [1, 8, 32], strides = [1, 1, 1]} : vector<4x8x32xf32> to vector<1x8x32xf32>
    %70 = vector.shape_cast %69 : vector<1x8x32xf32> to vector<8x32xf32>
    %71 = vector.shape_cast %70 : vector<8x32xf32> to vector<1x8x32xf32>
    %72 = vector.broadcast %68 : vector<8x1x32xf32> to vector<8x8x32xf32>
    %73 = vector.broadcast %71 : vector<1x8x32xf32> to vector<8x8x32xf32>
    %74 = arith.mulf %72, %73 : vector<8x8x32xf32>
    %75 = arith.addf %65, %74 : vector<8x8x32xf32>
    %cst_17 = arith.constant 2.500000e-01 : f32
    %76 = vector.broadcast %cst_17 : f32 to vector<8x8x32xf32>
    %77 = arith.mulf %75, %76 : vector<8x8x32xf32>
    %78 = vector.shape_cast %77 : vector<8x8x32xf32> to vector<64x32xf32>
    %c0_18 = arith.constant 0 : index
    %c0_19 = arith.constant 0 : index
    %79 = vector.load %arg6[%c0_18, %c0_19] : memref<32x32xf32, #tpu.memory_space<vmem>>, vector<32x32xf32>
    %cst_20 = arith.constant dense<0.000000e+00> : vector<64x32xf32>
    %80 = tpu.matmul %78, %79, %cst_20 {dimension_numbers = #tpu.dot_dimension_numbers<[1], [0], [0], [1], [0, 0, 1, 1], [], []>} : vector<64x32xf32>, vector<32x32xf32>, vector<64x32xf32> -> vector<64x32xf32>
    %c0_21 = arith.constant 0 : index
    %c0_22 = arith.constant 0 : index
    %81 = vector.load %arg7[%c0_21, %c0_22] : memref<1x32xf32, #tpu.memory_space<vmem>>, vector<1x32xf32>
    %82 = vector.broadcast %81 : vector<1x32xf32> to vector<64x32xf32>
    %83 = arith.addf %80, %82 : vector<64x32xf32>
    %84 = vector.shape_cast %83 : vector<64x32xf32> to vector<8x8x32xf32>
    %c0_23 = arith.constant 0 : index
    %c0_24 = arith.constant 0 : index
    %c0_25 = arith.constant 0 : index
    %c0_26 = arith.constant 0 : index
    %85 = vector.load %arg8[%c0_23, %c0_24, %c0_25, %c0_26] : memref<1x8x8x32xf32, #tpu.memory_space<vmem>>, vector<1x8x8x32xf32>
    %86 = vector.shape_cast %85 : vector<1x8x8x32xf32> to vector<8x8x32xf32>
    %87 = vector.shape_cast %84 : vector<8x8x32xf32> to vector<1x8x8x32xf32>
    tpu.vector_store %arg8[%c0_23, %c0_24, %c0_25, %c0_26], %87 {strides = array<i32>} : memref<1x8x8x32xf32, #tpu.memory_space<vmem>>, vector<1x8x8x32xf32>,
    return
  }
  func.func @transform_0(%arg0: i32) -> (i32, i32, i32, i32) {
    %c0_i32 = arith.constant 0 : i32
    %c0_i32_0 = arith.constant 0 : i32
    %c0_i32_1 = arith.constant 0 : i32
    %c0_i32_2 = arith.constant 0 : i32
    return %arg0, %c0_i32, %c0_i32_0, %c0_i32_1 : i32, i32, i32, i32
  }
  func.func @transform_1(%arg0: i32) -> (i32, i32) {
    %c0_i32 = arith.constant 0 : i32
    %c0_i32_0 = arith.constant 0 : i32
    %c0_i32_1 = arith.constant 0 : i32
    return %c0_i32, %c0_i32_0 : i32, i32
  }
  func.func @transform_2(%arg0: i32) -> (i32, i32) {
    %c0_i32 = arith.constant 0 : i32
    %c0_i32_0 = arith.constant 0 : i32
    %c0_i32_1 = arith.constant 0 : i32
    return %c0_i32, %c0_i32_0 : i32, i32
  }
  func.func @transform_3(%arg0: i32) -> (i32, i32) {
    %c0_i32 = arith.constant 0 : i32
    %c0_i32_0 = arith.constant 0 : i32
    %c0_i32_1 = arith.constant 0 : i32
    return %c0_i32, %c0_i32_0 : i32, i32
  }
  func.func @transform_4(%arg0: i32) -> (i32, i32) {
    %c0_i32 = arith.constant 0 : i32
    %c0_i32_0 = arith.constant 0 : i32
    %c0_i32_1 = arith.constant 0 : i32
    return %c0_i32, %c0_i32_0 : i32, i32
  }
  func.func @transform_5(%arg0: i32) -> (i32, i32) {
    %c0_i32 = arith.constant 0 : i32
    %c0_i32_0 = arith.constant 0 : i32
    %c0_i32_1 = arith.constant 0 : i32
    return %c0_i32, %c0_i32_0 : i32, i32
  }
  func.func @transform_6(%arg0: i32) -> (i32, i32) {
    %c0_i32 = arith.constant 0 : i32
    %c0_i32_0 = arith.constant 0 : i32
    %c0_i32_1 = arith.constant 0 : i32
    return %c0_i32, %c0_i32_0 : i32, i32
  }
  func.func @transform_7(%arg0: i32) -> (i32, i32, i32, i32) {
    %c0_i32 = arith.constant 0 : i32
    %c0_i32_0 = arith.constant 0 : i32
    %c0_i32_1 = arith.constant 0 : i32
    %c0_i32_2 = arith.constant 0 : i32
    return %arg0, %c0_i32, %c0_i32_0, %c0_i32_1 : i32, i32, i32, i32
  }
}

</mosaic_0001>

<bundles_post_ra>
// kernel: _lambda_.1
= control target key start
LH: loop header
LB: loop body
LE: loop exit
PB: predicated region body
PF: predicated region fallthrough
CT: control target
= control target key end

     0   :  { %s1548_s0 = inlined_call_operand.hbm [shape: f32[2,4,8,32], index: 0, kind: input, shape index: {}]   ;;  %s1549_s1 = inlined_call_operand.vmem [shape: f32[1,32], index: 1, kind: input, shape index: {}]   ;;  %s1550_s2 = inlined_call_operand.vmem [shape: f32[1,32], index: 2, kind: input, shape index: {}]   ;;  %s1551_s3 = inlined_call_operand.hbm [shape: f32[32,64], index: 3, kind: input, shape index: {}]   ;;  %s1552_s4 = inlined_call_operand.hbm [shape: f32[1,64], index: 4, kind: input, shape index: {}]   ;;  %s1553_s5 = inlined_call_operand.hbm [shape: f32[32,32], index: 5, kind: input, shape index: {}]   ;;  %s1554_s6 = inlined_call_operand.vmem [shape: f32[1,32], index: 6, kind: input, shape index: {}]   ;;  %s1555_s7 = inlined_call_operand.hbm [shape: f32[2,8,8,32], index: 7, kind: output, shape index: {}]  }
   0x1   :  { %1558 = sst [smem:[#allocation15_spill]] %s1551_s3 }
   0x2   :  { %12 = vsyncpa [#allocation3], 0 }
   0x3   :  { %14 = vsyncpa [#allocation3 + $0x1], 0 }
   0x4   :  { %15 = vsyncpa [#allocation6], 0 }
   0x5   :  { %16 = vsyncpa [#allocation9], 0 }
   0x6   :  { %17 = vsyncpa [#allocation4], 0 }
   0x7   :  { %19 = vsyncpa [#allocation4 + $0x1], 0  ;;  %s1279_s24 = smov 0   ;;  %s1281_s25 = smov 0  }
   0x8   :  { %s1283_s26 = smov 0   ;;  %s1285_s27 = smov 0  }
   0x9 LB: > { %s1300_s28 = sadd.s32 4294967295, %s1228_s27   ;;  %s891_s29 = sadd.s32 4294967294, %s1228_s27   ;;  %s1228_s27 = sphi %s1285_s27, %s1572_s27   ;;  %s1224_s26 = sphi %s1283_s26, %s1571_s26   ;;  %s1220_s25 = sphi %s1281_s25, %s1570_s25   ;;  %s1216_s24 = sphi %s1279_s24, %s1569_s24  }
   0xa   : > { %p45_p0 = scmp.ne.s32.totalorder %s1220_s25, %s1216_s24  ;;  %p46_p1 = scmp.eq.s32.totalorder %s1300_s28, 0 }
   0xb   : > { %p195_p2 = scmp.eq.s32.totalorder %s1300_s28, 1  ;;  %p201_p3 = scmp.eq.s32.totalorder %s891_s29, 1 }
   0xc   : > { %p1309_p4 = por %p46_p1, %p45_p0  ;;  %p892_p5 = scmp.ge.s32.totalorder %s1228_s27, 1 }
   0xd   : > { %p1314_p6 = por %p201_p3, %p45_p0  ;;  %p208_p7 = scmp.lt.s32.totalorder %s1228_s27, 3 }
   0xe   : > { %s1561_s3 = sld [smem:[#allocation15_spill]]  ;;  %s1230_s13 = smov [#allocation5]  }
   0xf   : > { %p1322_p8 = pnand %p892_p5, %p208_p7  ;;  %s227_s14 = sshll.u32 %s1230_s13, 4  ;;  %s228_s14 = int_to_ptr.vmem [resolvable:$true] %s227_s14 }
  0x10   : > { %s240_s18 = sshll.u32 %s1552_s4, 4  ;;  %s1556_s19 = smov 128   ;;  %s241_s18 = int_to_ptr.hbm [resolvable:$true] %s240_s18 }
  0x11   : > { %p953_p9 = pneg %p1322_p8  ;;  %s1557_s20 = smov 8  }
  0x12   : > { %s1233_s21 = smov [#allocation7]   ;;  %s251_s9 = sshll.u32 %s1553_s5, 4  ;;  %s252_s9 = int_to_ptr.hbm [resolvable:$true] %s251_s9 }
  0x13   : > { %p1330_p10 = pnand %p953_p9, %p46_p1  ;;  %s242_s22 = sshll.u32 %s1233_s21, 4  ;;  %s243_s22 = int_to_ptr.vmem [resolvable:$true] %s242_s22 }
  0x14   : > { %s225_s11 = sshll.u32 %s1561_s3, 4  ;;  %s1234_s10 = smov [#allocation8]   ;;  %s226_s11 = int_to_ptr.hbm [resolvable:$true] %s225_s11 }
  0x15   : > { %956 = dma.hbm_to_vmem [thread:$0]  (!%p1330_p10), %s226_s11, 512, %s228_s14, [#allocation6], %s1556_s19, %s1556_s19, %s1557_s20  }
  0x16   : > { %959 = dma.hbm_to_vmem [thread:$0]  (!%p1330_p10), %s241_s18, 16, %s243_s22, [#allocation6]  }
  0x17   : > { %s253_s13 = sshll.u32 %s1234_s10, 4  ;;  %s1349_s11 = sadd.s32 1, %s1228_s27   ;;  %s254_s13 = int_to_ptr.vmem [resolvable:$true] %s253_s13 }
  0x18   : > { %962 = dma.hbm_to_vmem [thread:$0]  (!%p1330_p10), %s252_s9, 512, %s254_s13, [#allocation9], %s1556_s19, %s1556_s19, %s1557_s20  }
  0x19   : > { %s29_s14 = ssub.s32 %s1228_s27, %s1349_s11  ;;  %s32_s16 = sadd.s32 1, %s1224_s26 }
  0x1a   : > { %p30_p12 = scmp.eq.s32.totalorder %s29_s14, 0  ;;  %p39_p13 = scmp.ne.s32.totalorder %s1224_s26, %s1220_s25 }
  0x1b   : > { %p40_p0 = scmp.eq.s32.totalorder %s1228_s27, 0  ;;  %p974_p5 = scmp.lt.s32.totalorder %s1228_s27, 2 }
  0x1c   : > { %s1363_s17 = scalar_select %p30_p12, %s1224_s26, %s32_s16  }
  0x1d   : > { %p1367_p3 = por %p195_p2, %p39_p13  ;;  %s270_s21 = sand.u32 1, %s1224_s26  }
  0x1e   : > { %s923_s15 = sshll.u32 %s1228_s27, 5  ;;  %p41_p7 = por %p40_p0, %p39_p13 }
  0x1f   : > { %s897_s22 = sshll.u32 %s270_s21, 5  ;;  %s279_s9 = scalar_lea.hbm %s1548_s0, %s923_s15 }
  0x20   : > { %s280_s10 = sshll.u32 %s279_s9, 4  ;;  %s274_s13 = scalar_lea.vmem [#allocation2], %s897_s22  ;;  %s281_s10 = int_to_ptr.hbm [resolvable:$true] %s280_s10 }
  0x21   : > { %s282_s14 = sshll.u32 %s274_s13, 4  ;;  %p1377_p9 = pnand %p974_p5, %p41_p7  ;;  %s283_s14 = int_to_ptr.vmem [resolvable:$true] %s282_s14 }
  0x22   : > { %s271_s19 = scalar_lea.sflag [#allocation3], %s270_s21  ;;  %s1124_s20 = sshra.s32 %s281_s10, 4  ;;  %s1125_s20 = int_to_ptr.hbm [resolvable:$true] %s1124_s20 }
  0x23   : > { %s1126_s3 = scalar_lea.hbm %s1125_s20, 32  ;;  %p1128_p10 = pneg %p1377_p9 }
  0x24   : > { %p1127_p2 = scmp.ne.s32.totalorder %s1125_s20, %s1126_s3  ;;  %s1131_s22 = scalar_lea.hbm %s1548_s0, 64 }
  0x25   : > { %p1132_p0 = scmp.lt.s32.totalorder %s1125_s20, %s1548_s0  ;;  %p1133_p5 = scmp.lt.s32.totalorder %s1131_s22, %s1126_s3 }
  0x26   : > { %p1129_p12 = pnand %p1128_p10, %p1127_p2 }
  0x27   : > { %p1134_p7 = por %p1133_p5, %p1132_p0 }
  0x28   : > { %p1130_p13 = pneg %p1129_p12 }
  0x2a   : > { %p1135_p11 = pnand %p1134_p7, %p1130_p13 }
  0x2c   : > { %1138 = shalt.err (!%p1135_p11)
}
  0x2d   : > { %s1566_s21 = smov 8   ;;  %s1567_s13 = smov 128  }
  0x2e   : > { %966 = dma.hbm_to_vmem [thread:$0]  (!%p1377_p9), %s281_s10, 512, %s283_s14, %s271_s19, %s1567_s13, %s1567_s13, %s1566_s21  }
  0x2f   : > { %294 = sbr.rel (%p1322_p8) target bundleno = 748 (0x2ec), region = 48  ;;  %s1397_s15 = sand.u32 (!%p1322_p8), 1, %s1220_s25  }
  0x30   : > { %s901_s20 = sshll.u32 (!%p1322_p8), %s1397_s15, 5  ;;  %s297_s3 = scalar_lea.sflag (!%p1322_p8), [#allocation3], %s1397_s15 }
  0x31   : > { %s300_s23 = scalar_lea.vmem (!%p1322_p8), [#allocation2], %s901_s20 }
  0x34   : > { %1199 = dma.done.wait (%p1309_p4), %s297_s3, 512  }
  0x35   : > { %1201 = vsyncadd (%p1309_p4), %s297_s3, 4294966784 }
  0x36   : > { %1203 = dma.done.wait (%p46_p1), [#allocation6], 528  }
  0x37   : > { %1205 = vsyncadd (%p46_p1), [#allocation6], 4294966768 }
  0x38   : > { %1207 = dma.done.wait (%p46_p1), [#allocation9], 512  }
  0x39   : > { %1209 = vsyncadd (%p46_p1), [#allocation9], 4294966784  ;;  %vm351_vm0 = vcmask 261120   ;;  %v350_v0 = vld [vmem:[%s300_s23 + $0x18] sm:$0xff]  ;;  %v347_v1 = vld [vmem:[%s300_s23] sm:$0xff]  ;;  %v1235_v8 = vmov 32.0  }
  0x3a   : > { %v361_v2 = vsel %vm351_vm0, %v350_v0, 0.0  ;;  %v352_v3 = vsel %vm351_vm0, %v347_v1, 0.0  ;;  %v349_v4 = vld [vmem:[%s300_s23 + $0x10] sm:$0xff]  ;;  %v348_v5 = vld [vmem:[%s300_s23 + $0x8] sm:$0xff]  ;;  %1024 = vrcp.f32 %v1235_v8  ;;  %v466_v35 = vld [vmem:[#allocation5 + $0x18] sm:$0xff]  ;;  %s1236_s14 = smov 96  }
  0x3b   : > { %362 = vadd.xlane.f32.xlu1 %v361_v2  ;;  %353 = vadd.xlane.f32.xlu0 %v352_v3  ;;  %v358_v6 = vsel %vm351_vm0, %v349_v4, 0.0  ;;  %v355_v7 = vsel %vm351_vm0, %v348_v5, 0.0  ;;  %v465_v36 = vld [vmem:[#allocation5 + $0x10] sm:$0xff]  ;;  %v464_v37 = vld [vmem:[#allocation5 + $0x8] sm:$0xff]  ;;  %v463_v38 = vld [vmem:[#allocation5] sm:$0xff]  ;;  %s905_s16 = sshll.u32 %s1397_s15, 6 }
  0x3c   : > { %495 = vmatpush.msra.mxu0 %v466_v35  ;;  %925 = vmatpush.msra.mxu3 %v466_v35  ;;  %v1020_v3 = vld [vmem:[%s1549_s1] ss:$0 sm:$0xff]  ;;  %s346_s9 = scalar_lea.vmem [#allocation10], %s905_s16  ;;  %s924_s21 = sshll.u32 %s1300_s28, 6 }
  0x3d   : > { %s785_s3 = scalar_lea.hbm %s1555_s7, %s924_s21  ;;  %s786_s23 = sshll.u32 %s346_s9, 4  ;;  %s787_s23 = int_to_ptr.vmem [resolvable:$true] %s786_s23 }
  0x3e   : > { %496 = vmatpush.msra.mxu0 %v465_v36  ;;  %926 = vmatpush.msra.mxu3 %v465_v36  ;;  %s788_s28 = sshll.u32 %s785_s3, 4  ;;  %s774_s30 = scalar_lea.sflag [#allocation4], %s1397_s15  ;;  %s789_s28 = int_to_ptr.hbm [resolvable:$true] %s788_s28 }
  0x3f   : > { %s1168_s12 = sshra.s32 %s789_s28, 4  ;;  %s1174_s16 = scalar_lea.hbm %s1555_s7, 128  ;;  %s1169_s12 = int_to_ptr.hbm [resolvable:$true] %s1168_s12 }
  0x40   : > { %v1025_v9 = vpop.eup %1024  ;;  %497 = vmatpush.msra.mxu0 %v464_v37  ;;  %927 = vmatpush.msra.mxu3 %v464_v37  ;;  %s1170_s19 = scalar_lea.hbm %s1169_s12, 64  ;;  %p1175_p11 = scmp.lt.s32.totalorder %s1169_s12, %s1555_s7 }
  0x41   : > { %v365_v10 = vmul.f32 32.0, %v1025_v9  ;;  %vm369_vm1 = vweird.f32 %v1025_v9  ;;  %p1171_p1 = scmp.ne.s32.totalorder %s1169_s12, %s1170_s19  ;;  %p1176_p9 = scmp.lt.s32.totalorder %s1174_s16, %s1170_s19 }
  0x42   : > { %498 = vmatpush.msra.mxu0 %v463_v38  ;;  %928 = vmatpush.msra.mxu3 %v463_v38  ;;  %v695_v38 = vld [vmem:[#allocation8 + $0x18] sm:$0xff] }
  0x43   : > { %359 = vadd.xlane.f32.xlu1 %v358_v6  ;;  %356 = vadd.xlane.f32.xlu0 %v355_v7  ;;  %v366_v11 = vsub.f32 1.0, %v365_v10  ;;  %p1172_p4 = pnand %p1171_p1, %p1367_p3  ;;  %p1177_p2 = por %p1176_p9, %p1175_p11 }
  0x44   : > { %736 = vmatpush.msra.mxu1 %v695_v38  ;;  %929 = vmatpush.msra.mxu2 %v695_v38 }
  0x45   : > { %v367_v12 = vmul.f32 %v1025_v9, %v366_v11  ;;  %930 = vmatpush.msrb.mxu3 %v695_v38  ;;  %p1173_p8 = pneg %p1172_p4 }
  0x47   : > { %v368_v13 = vadd.f32 %v1025_v9, %v367_v12  ;;  %p1178_p10 = pnand %p1177_p2, %p1173_p8 }
  0x49   : > { %v370_v14 = vsel %vm369_vm1, %v1025_v9, %v368_v13  ;;  %v1021_v9 = vld [vmem:[%s1550_s2] ss:$0 sm:$0xff] }
  0xae   : > { %v363_v15 = vpop.xlane.xlu1 %362  ;;  %v354_v16 = vpop.xlane.xlu0 %353 }
  0xaf   : > { %v374_v17 = vmul.f32 %v370_v14, %v363_v15  ;;  %v371_v18 = vmul.f32 %v370_v14, %v354_v16 }
  0xb1   : > { %v1417_v19 = vsub.f32 %v350_v0, %v374_v17  ;;  %v1419_v20 = vsub.f32 %v347_v1, %v371_v18 }
  0xb3   : > { %v382_v21 = vmul.f32 %v1417_v19, %v1417_v19  ;;  %v379_v22 = vmul.f32 %v1419_v20, %v1419_v20 }
  0xb5   : > { %v392_v23 = vsel %vm351_vm0, %v382_v21, 0.0  ;;  %v383_v24 = vsel %vm351_vm0, %v379_v22, 0.0 }
  0xb6   : > { %v360_v25 = vpop.xlane.xlu1 %359  ;;  %393 = vadd.xlane.f32.xlu0 %v392_v23  ;;  %384 = vadd.xlane.f32.xlu2 %v383_v24  ;;  %v357_v26 = vpop.xlane.xlu0 %356 }
  0xb7   : > { %v373_v27 = vmul.f32 %v370_v14, %v360_v25  ;;  %v372_v28 = vmul.f32 %v370_v14, %v357_v26 }
  0xb9   : > { %v1427_v29 = vsub.f32 %v349_v4, %v373_v27  ;;  %v1429_v30 = vsub.f32 %v348_v5, %v372_v28 }
  0xbb   : > { %v381_v31 = vmul.f32 %v1427_v29, %v1427_v29  ;;  %v380_v32 = vmul.f32 %v1429_v30, %v1429_v30 }
  0xbd   : > { %v389_v33 = vsel %vm351_vm0, %v381_v31, 0.0  ;;  %v386_v34 = vsel %vm351_vm0, %v380_v32, 0.0  ;;  %v1022_v31 = vld [vmem:[#allocation7] ss:$0 sm:$0xff] }
  0xbe   : > { %390 = vadd.xlane.f32.xlu1 %v389_v33  ;;  %387 = vadd.xlane.f32.xlu2 %v386_v34 }
 0x129   : > { %v385_v39 = vpop.xlane.xlu2 %384  ;;  %v394_v40 = vpop.xlane.xlu0 %393 }
 0x12a   : > { %v395_v41 = vmul.f32 %v385_v39, %v370_v14  ;;  %v398_v42 = vmul.f32 %v394_v40, %v370_v14  ;;  %v694_v39 = vld [vmem:[#allocation8 + $0x10] sm:$0xff]  ;;  %v693_v40 = vld [vmem:[#allocation8 + $0x8] sm:$0xff] }
 0x12b   : > { %737 = vmatpush.msra.mxu1 %v694_v39  ;;  %931 = vmatpush.msra.mxu2 %v694_v39 }
 0x12c   : > { %v399_v43 = vadd.f32 1e-05, %v395_v41  ;;  %v402_v44 = vadd.f32 1e-05, %v398_v42  ;;  %932 = vmatpush.msrb.mxu3 %v694_v39  ;;  %v692_v41 = vld [vmem:[#allocation8] sm:$0xff] }
 0x12d   : > { %738 = vmatpush.msra.mxu1 %v693_v40  ;;  %933 = vmatpush.msra.mxu2 %v693_v40 }
 0x12e   : > { %1026 = vrsqrt.f32 %v399_v43  ;;  %vm439_vm3 = vweird.f32 %v402_v44  ;;  %vm409_vm5 = vweird.f32 %v399_v43  ;;  %934 = vmatpush.msrb.mxu3 %v693_v40 }
 0x12f   : > { %1028 = vrsqrt.f32 %v402_v44  ;;  %739 = vmatpush.msra.mxu1 %v692_v41  ;;  %935 = vmatpush.msra.mxu2 %v692_v41 }
 0x130   : > { %936 = vmatpush.msrb.mxu3 %v692_v41 }
 0x131   : > { %v391_v45 = vpop.xlane.xlu1 %390  ;;  %v388_v46 = vpop.xlane.xlu2 %387 }
 0x132   : > { %v397_v47 = vmul.f32 %v391_v45, %v370_v14  ;;  %v396_v48 = vmul.f32 %v388_v46, %v370_v14 }
 0x134   : > { %v1027_v49 = vpop.eup %1026  ;;  %v401_v50 = vadd.f32 1e-05, %v397_v47  ;;  %v400_v51 = vadd.f32 1e-05, %v396_v48 }
 0x135   : > { %v1029_v52 = vpop.eup %1028  ;;  %v404_v53 = vmul.f32 %v1027_v49, %v399_v43  ;;  %vm410_vm2 = vweird.f32 %v1027_v49 }
 0x136   : > { %v434_v54 = vmul.f32 %v1029_v52, %v402_v44  ;;  %1030 = vrsqrt.f32 %v401_v50  ;;  %vm440_vm4 = vweird.f32 %v1029_v52  ;;  %vm411_vm6 = vmor %vm409_vm5, %vm410_vm2  ;;  %vm429_vm9 = vweird.f32 %v401_v50 }
 0x137   : > { %v405_v55 = vmul.f32 %v1027_v49, %v404_v53  ;;  %1032 = vrsqrt.f32 %v400_v51  ;;  %vm441_vm7 = vmor %vm439_vm3, %vm440_vm4  ;;  %vm419_vm11 = vweird.f32 %v400_v51 }
 0x138   : > { %v435_v56 = vmul.f32 %v1029_v52, %v434_v54 }
 0x139   : > { %v406_v57 = vmul.f32 0.5, %v405_v55 }
 0x13a   : > { %v436_v58 = vmul.f32 0.5, %v435_v56 }
 0x13b   : > { %v407_v59 = vsub.f32 1.5, %v406_v57 }
 0x13c   : > { %v1031_v60 = vpop.eup %1030  ;;  %v437_v61 = vsub.f32 1.5, %v436_v58 }
 0x13d   : > { %v1033_v62 = vpop.eup %1032  ;;  %v408_v63 = vmul.f32 %v1027_v49, %v407_v59  ;;  %v424_v0 = vmul.f32 %v1031_v60, %v401_v50  ;;  %vm430_vm10 = vweird.f32 %v1031_v60 }
 0x13e   : > { %v438_v1 = vmul.f32 %v1029_v52, %v437_v61  ;;  %v414_v2 = vmul.f32 %v1033_v62, %v400_v51  ;;  %vm420_vm8 = vweird.f32 %v1033_v62  ;;  %vm431_vm13 = vmor %vm429_vm9, %vm430_vm10 }
 0x13f   : > { %v412_v4 = vsel %vm411_vm6, %v1027_v49, %v408_v63  ;;  %v425_v5 = vmul.f32 %v1031_v60, %v424_v0  ;;  %vm421_vm12 = vmor %vm419_vm11, %vm420_vm8 }
 0x140   : > { %v442_v6 = vsel %vm441_vm7, %v1029_v52, %v438_v1  ;;  %v415_v7 = vmul.f32 %v1033_v62, %v414_v2  ;;  %v443_v8 = vmul.f32 %v412_v4, %v1419_v20 }
 0x141   : > { %v426_v10 = vmul.f32 0.5, %v425_v5  ;;  %v446_v11 = vmul.f32 %v442_v6, %v1417_v19 }
 0x142   : > { %v416_v12 = vmul.f32 0.5, %v415_v7  ;;  %v451_v13 = vmul.f32 %v1020_v3, %v443_v8 }
 0x143   : > { %v427_v14 = vsub.f32 1.5, %v426_v10  ;;  %v454_v15 = vmul.f32 %v1020_v3, %v446_v11 }
 0x144   : > { %v417_v16 = vsub.f32 1.5, %v416_v12  ;;  %v459_v17 = vadd.f32 %v1021_v9, %v451_v13 }
 0x145   : > { %v462_v18 = vadd.f32 %v1021_v9, %v454_v15  ;;  %v428_v21 = vmul.f32 %v1031_v60, %v427_v14 }
 0x146   : > { %v418_v22 = vmul.f32 %v1033_v62, %v417_v16  ;;  %906 = vmatmul.msk.f32.vlgmr.msra.gmra.mxu0 %vm351_vm0, %v459_v17 }
 0x147   : > { %909 = vmatmul.msk.f32.vlgmr.msra.gmra.mxu3 %vm351_vm0, %v462_v18  ;;  %v432_v23 = vsel %vm431_vm13, %v1031_v60, %v428_v21 }
 0x148   : > { %v422_v20 = vsel %vm421_vm12, %v1033_v62, %v418_v22  ;;  %v445_v26 = vmul.f32 %v432_v23, %v1427_v29 }
 0x149   : > { %v444_v19 = vmul.f32 %v422_v20, %v1429_v30 }
 0x14a   : > { %v453_v27 = vmul.f32 %v1020_v3, %v445_v26 }
 0x14b   : > { %v452_v24 = vmul.f32 %v1020_v3, %v444_v19 }
 0x14c   : > { %v461_v28 = vadd.f32 %v1021_v9, %v453_v27 }
 0x14d   : > { %v460_v25 = vadd.f32 %v1021_v9, %v452_v24 }
 0x14f   : > { %907 = vmatmul.msk.f32.gmra.mxu0 %vm351_vm0, %v460_v25 }
 0x157   : > { %908 = vmatmul.msk.f32.gmra.mxu0 %vm351_vm0, %v461_v28 }
 0x1c3   : > { %v500_v32 = vpop.f32.mrf.mxu0 }
 0x1c4   : > { %v1451_v33 = vadd.f32 %v1022_v31, %v500_v32 }
 0x1c6   : > { %536 = vrot.lane.b32.xlu2 %v1451_v33, %s1236_s14  ;;  %v515_v42 = vrot.slane %v1451_v33, 3  ;;  %v518_v43 = vrot.slane %v1451_v33, 6  ;;  %v513_v44 = vrot.slane %v1451_v33, 1  ;;  %v516_v45 = vrot.slane %v1451_v33, 4 }
 0x1c7   : > { %v519_v46 = vrot.slane %v1451_v33, 7  ;;  %v514_v47 = vrot.slane %v1451_v33, 2  ;;  %v517_v48 = vrot.slane %v1451_v33, 5  ;;  %v520_v49 = vperm.slane %v1451_v33, 0 }
 0x1c8   : > { %v523_v50 = vperm.slane %v515_v42, 0  ;;  %v526_v51 = vperm.slane %v518_v43, 0  ;;  %v521_v52 = vperm.slane %v513_v44, 0  ;;  %v524_v53 = vperm.slane %v516_v45, 0 }
 0x1c9   : > { %v527_v55 = vperm.slane %v519_v46, 0  ;;  %v522_v56 = vperm.slane %v514_v47, 0  ;;  %v525_v57 = vperm.slane %v517_v48, 0 }
 0x1ca   : > { %v509_v34 = vpop.f32.mrf.mxu3 }
 0x1cb   : > { %v1454_v30 = vadd.f32 %v1022_v31, %v509_v34 }
 0x1cc   : > { %v503_v35 = vpop.f32.mrf.mxu0 }
 0x1cd   : > { %v1456_v36 = vadd.f32 %v1022_v31, %v503_v35  ;;  %v644_v54 = vrot.slane %v1454_v30, 3  ;;  %v647_v60 = vrot.slane %v1454_v30, 6  ;;  %v642_v61 = vrot.slane %v1454_v30, 1 }
 0x1ce   : > { %665 = vrot.lane.b32.xlu2 %v1454_v30, %s1236_s14  ;;  %v645_v0 = vrot.slane %v1454_v30, 4  ;;  %v648_v1 = vrot.slane %v1454_v30, 7  ;;  %v643_v4 = vrot.slane %v1454_v30, 2  ;;  %v649_v7 = vperm.slane %v1454_v30, 0 }
 0x1cf   : > { %579 = vrot.lane.b32.xlu0 %v1456_v36, %s1236_s14  ;;  %v558_v58 = vrot.slane %v1456_v36, 3  ;;  %v561_v59 = vrot.slane %v1456_v36, 6  ;;  %v556_v62 = vrot.slane %v1456_v36, 1  ;;  %v559_v63 = vrot.slane %v1456_v36, 4 }
 0x1d0   : > { %v562_v2 = vrot.slane %v1456_v36, 7  ;;  %v557_v3 = vrot.slane %v1456_v36, 2  ;;  %v560_v5 = vrot.slane %v1456_v36, 5  ;;  %v563_v6 = vperm.slane %v1456_v36, 0 }
 0x1d1   : > { %v652_v8 = vperm.slane %v644_v54, 0  ;;  %v646_v9 = vrot.slane %v1454_v30, 5  ;;  %v566_v11 = vperm.slane %v558_v58, 0  ;;  %v569_v12 = vperm.slane %v561_v59, 0 }
 0x1d2   : > { %v655_v13 = vperm.slane %v647_v60, 0  ;;  %v650_v14 = vperm.slane %v642_v61, 0  ;;  %v564_v15 = vperm.slane %v556_v62, 0  ;;  %v567_v16 = vperm.slane %v559_v63, 0 }
 0x1d3   : > { %v653_v17 = vperm.slane %v645_v0, 0  ;;  %v656_v18 = vperm.slane %v648_v1, 0  ;;  %v570_v21 = vperm.slane %v562_v2, 0  ;;  %v565_v22 = vperm.slane %v557_v3, 0 }
 0x1d4   : > { %v506_v29 = vpop.f32.mrf.mxu0  ;;  %v651_v20 = vperm.slane %v643_v4, 0  ;;  %v568_v19 = vperm.slane %v560_v5, 0  ;;  %v654_v26 = vperm.slane %v646_v9, 0 }
 0x1d5   : > { %v1460_v37 = vadd.f32 %v1022_v31, %v506_v29 }
 0x1d7   : > { %622 = vrot.lane.b32.xlu1 %v1460_v37, %s1236_s14  ;;  %v601_v23 = vrot.slane %v1460_v37, 3  ;;  %v604_v24 = vrot.slane %v1460_v37, 6  ;;  %v599_v25 = vrot.slane %v1460_v37, 1  ;;  %v602_v27 = vrot.slane %v1460_v37, 4 }
 0x1d8   : > { %v605_v28 = vrot.slane %v1460_v37, 7  ;;  %v600_v31 = vrot.slane %v1460_v37, 2  ;;  %v603_v32 = vrot.slane %v1460_v37, 5 }
 0x1d9   : > { %v607_v61 = vperm.slane %v599_v25, 0  ;;  %v610_v62 = vperm.slane %v602_v27, 0 }
 0x1da   : > { %v613_v63 = vperm.slane %v605_v28, 0  ;;  %v608_v0 = vperm.slane %v600_v31, 0  ;;  %v611_v1 = vperm.slane %v603_v32, 0 }
 0x220   : > { %v537_v10 = vpop.permute.xlu2 %536 }
 0x221   : > { %v539_v33 = vmul.f32 %v537_v10, %v520_v49  ;;  %v542_v34 = vmul.f32 %v537_v10, %v523_v50  ;;  %v545_v30 = vmul.f32 %v537_v10, %v526_v51  ;;  %v540_v35 = vmul.f32 %v537_v10, %v521_v52 }
 0x222   : > { %v543_v29 = vmul.f32 %v537_v10, %v524_v53  ;;  %v546_v38 = vmul.f32 %v537_v10, %v527_v55  ;;  %v541_v39 = vmul.f32 %v537_v10, %v522_v56  ;;  %v544_v40 = vmul.f32 %v537_v10, %v525_v57 }
 0x223   : > { %v606_v55 = vperm.slane %v1460_v37, 0  ;;  %v609_v56 = vperm.slane %v601_v23, 0  ;;  %v612_v57 = vperm.slane %v604_v24, 0 }
 0x228   : > { %v666_v50 = vpop.permute.xlu2 %665 }
 0x229   : > { %v668_v2 = vmul.f32 %v666_v50, %v649_v7  ;;  %v671_v3 = vmul.f32 %v666_v50, %v652_v8  ;;  %v674_v4 = vmul.f32 %v666_v50, %v655_v13  ;;  %v669_v5 = vmul.f32 %v666_v50, %v650_v14 }
 0x22a   : > { %v672_v9 = vmul.f32 %v666_v50, %v653_v17  ;;  %v675_v10 = vmul.f32 %v666_v50, %v656_v18 }
 0x241   : > { %v580_v36 = vpop.permute.xlu0 %579 }
 0x242   : > { %v582_v41 = vmul.f32 %v580_v36, %v563_v6  ;;  %v585_v42 = vmul.f32 %v580_v36, %v566_v11  ;;  %v588_v43 = vmul.f32 %v580_v36, %v569_v12  ;;  %v583_v44 = vmul.f32 %v580_v36, %v564_v15 }
 0x243   : > { %v586_v45 = vmul.f32 %v580_v36, %v567_v16  ;;  %v589_v46 = vmul.f32 %v580_v36, %v570_v21  ;;  %v584_v47 = vmul.f32 %v580_v36, %v565_v22  ;;  %v587_v48 = vmul.f32 %v580_v36, %v568_v19 }
 0x244   : > { %v590_v54 = vadd.f32 %v582_v41, %v539_v33  ;;  %v593_v58 = vadd.f32 %v585_v42, %v542_v34  ;;  %v596_v59 = vadd.f32 %v588_v43, %v545_v30  ;;  %v591_v49 = vadd.f32 %v583_v44, %v540_v35  ;;  %v1023_v43 = vld [vmem:[%s1554_s6] ss:$0 sm:$0xff] }
 0x245   : > { %v594_v51 = vadd.f32 %v586_v45, %v543_v29  ;;  %v597_v52 = vadd.f32 %v589_v46, %v546_v38  ;;  %v592_v60 = vadd.f32 %v584_v47, %v541_v39  ;;  %v595_v53 = vadd.f32 %v587_v48, %v544_v40 }
 0x246   : > { %v670_v11 = vmul.f32 %v666_v50, %v651_v20  ;;  %v673_v12 = vmul.f32 %v666_v50, %v654_v26 }
 0x249   : > { %v623_v6 = vpop.permute.xlu1 %622 }
 0x24a   : > { %v625_v15 = vmul.f32 %v623_v6, %v606_v55  ;;  %v628_v16 = vmul.f32 %v623_v6, %v609_v56  ;;  %v631_v21 = vmul.f32 %v623_v6, %v612_v57  ;;  %v626_v37 = vmul.f32 %v623_v6, %v607_v61 }
 0x24b   : > { %v629_v22 = vmul.f32 %v623_v6, %v610_v62  ;;  %v632_v19 = vmul.f32 %v623_v6, %v613_v63  ;;  %v627_v23 = vmul.f32 %v623_v6, %v608_v0  ;;  %v630_v24 = vmul.f32 %v623_v6, %v611_v1 }
 0x24c   : > { %v633_v25 = vadd.f32 %v625_v15, %v590_v54  ;;  %v636_v27 = vadd.f32 %v628_v16, %v593_v58  ;;  %v639_v28 = vadd.f32 %v631_v21, %v596_v59  ;;  %v634_v7 = vadd.f32 %v626_v37, %v591_v49 }
 0x24d   : > { %v637_v8 = vadd.f32 %v629_v22, %v594_v51  ;;  %v640_v13 = vadd.f32 %v632_v19, %v597_v52  ;;  %v635_v14 = vadd.f32 %v627_v23, %v592_v60  ;;  %v638_v31 = vadd.f32 %v630_v24, %v595_v53 }
 0x24e   : > { %v676_v17 = vadd.f32 %v668_v2, %v633_v25  ;;  %v679_v18 = vadd.f32 %v671_v3, %v636_v27  ;;  %v682_v20 = vadd.f32 %v674_v4, %v639_v28  ;;  %v677_v26 = vadd.f32 %v669_v5, %v634_v7 }
 0x24f   : > { %v680_v32 = vadd.f32 %v672_v9, %v637_v8  ;;  %v683_v33 = vadd.f32 %v675_v10, %v640_v13  ;;  %v678_v34 = vadd.f32 %v670_v11, %v635_v14  ;;  %v681_v30 = vadd.f32 %v673_v12, %v638_v31 }
 0x250   : > { %v684_v35 = vmul.f32 0.25, %v676_v17  ;;  %v687_v36 = vmul.f32 0.25, %v679_v18  ;;  %v690_v29 = vmul.f32 0.25, %v682_v20  ;;  %v685_v38 = vmul.f32 0.25, %v677_v26 }
 0x251   : > { %v688_v39 = vmul.f32 0.25, %v680_v32  ;;  %v691_v40 = vmul.f32 0.25, %v683_v33  ;;  %v686_v41 = vmul.f32 0.25, %v678_v34  ;;  %v689_v42 = vmul.f32 0.25, %v681_v30 }
 0x252   : > { %910 = vmatmul.msk.f32.vlgmr.msra.gmra.mxu1 %vm351_vm0, %v684_v35  ;;  %913 = vmatmul.msk.f32.vlgmr.msra.gmra.mxu2 %vm351_vm0, %v687_v36 }
 0x253   : > { %916 = vmatmul.msk.f32.vlgmr.msrb.gmra.mxu3 %vm351_vm0, %v690_v29 }
 0x25a   : > { %911 = vmatmul.msk.f32.gmra.mxu1 %vm351_vm0, %v685_v38  ;;  %914 = vmatmul.msk.f32.gmra.mxu2 %vm351_vm0, %v688_v39 }
 0x25b   : > { %917 = vmatmul.msk.f32.gmra.mxu3 %vm351_vm0, %v691_v40 }
 0x262   : > { %912 = vmatmul.msk.f32.gmra.mxu1 %vm351_vm0, %v686_v41  ;;  %915 = vmatmul.msk.f32.gmra.mxu2 %vm351_vm0, %v689_v42 }
 0x2cf   : > { %v741_v44 = vpop.f32.mrf.mxu1 }
 0x2d0   : > { %v742_v45 = vadd.f32 %v1023_v43, %v741_v44 }
 0x2d2   : > { %765 = vst.msk [vmem:[%s346_s9] sm:$0xff] %vm351_vm0, %v742_v45 }
 0x2d5   : > { %v750_v46 = vpop.f32.mrf.mxu2 }
 0x2d6   : > { %v751_v47 = vadd.f32 %v1023_v43, %v750_v46  ;;  %v759_v48 = vpop.f32.mrf.mxu3 }
 0x2d7   : > { %v760_v54 = vadd.f32 %v1023_v43, %v759_v48  ;;  %v744_v58 = vpop.f32.mrf.mxu1 }
 0x2d8   : > { %768 = vst.msk [vmem:[%s346_s9 + $0x18] sm:$0xff] %vm351_vm0, %v751_v47  ;;  %v745_v59 = vadd.f32 %v1023_v43, %v744_v58 }
 0x2d9   : > { %771 = vst.msk [vmem:[%s346_s9 + $0x30] sm:$0xff] %vm351_vm0, %v760_v54 }
 0x2da   : > { %766 = vst.msk [vmem:[%s346_s9 + $0x8] sm:$0xff] %vm351_vm0, %v745_v59 }
 0x2dd   : > { %v753_v49 = vpop.f32.mrf.mxu2 }
 0x2de   : > { %v754_v50 = vadd.f32 %v1023_v43, %v753_v49  ;;  %v762_v51 = vpop.f32.mrf.mxu3 }
 0x2df   : > { %v763_v52 = vadd.f32 %v1023_v43, %v762_v51  ;;  %v747_v60 = vpop.f32.mrf.mxu1 }
 0x2e0   : > { %769 = vst.msk [vmem:[%s346_s9 + $0x20] sm:$0xff] %vm351_vm0, %v754_v50  ;;  %v748_v53 = vadd.f32 %v1023_v43, %v747_v60 }
 0x2e1   : > { %772 = vst.msk [vmem:[%s346_s9 + $0x38] sm:$0xff] %vm351_vm0, %v763_v52 }
 0x2e2   : > { %767 = vst.msk [vmem:[%s346_s9 + $0x10] sm:$0xff] %vm351_vm0, %v748_v53 }
 0x2e5   : > { %v756_v55 = vpop.f32.mrf.mxu2 }
 0x2e6   : > { %v757_v56 = vadd.f32 %v1023_v43, %v756_v55 }
 0x2e8   : > { %770 = vst.msk [vmem:[%s346_s9 + $0x28] sm:$0xff] %vm351_vm0, %v757_v56 }
 0x2e9   : > { %1181 = shalt.err (!%p1178_p10)
}
 0x2ea   : > { %s1237_s15 = smov 128   ;;  %s1238_s9 = smov 8  }
 0x2eb   : > { %951 = dma.vmem_to_hbm [thread:$0]  (%p1367_p3), %s787_s23, 1024, %s789_s28, %s774_s30, %s1237_s15, %s1237_s15, %s1238_s9  }
 0x2ec PF: > { %s803_s21 = sand.u32 1, %s1216_s24   ;;  %p1568_p12 = scmp.ge.s32.totalorder %s1228_s27, 2 }
 0x2ed   : > { %s804_s13 = scalar_lea.sflag [#allocation4], %s803_s21 }
 0x2ee   : > { %p968_p13 = pnand %p1568_p12, %p1314_p6 }
 0x2f0   : > { %p969_p0 = pneg %p968_p13 }
 0x2f2   : > { %1211 = dma.done.wait (%p969_p0), %s804_s13, 1024  }
 0x2f3   : > { %1213 = vsyncadd (%p969_p0), %s804_s13, 4294966272  ;;  %p22_p5 = scmp.ge.s32.totalorder %s1349_s11, 4   ;;  %s1569_s24 = smov %s1220_s25 }
 0x2f4   : > { %s1570_s25 = smov %s1224_s26  ;;  %s1571_s26 = smov %s1363_s17 }
 0x2f5   : > { %s1572_s27 = smov %s1349_s11  ;;  %24 = sbr.rel (!%p22_p5) target bundleno = 9 (0x9), region = 105 }
 0x2fa   :  { %810 = vsyncpa [#allocation3], 1 }
 0x2fb   :  { %812 = vsyncpa [#allocation3 + $0x1], 1 }
 0x2fc   :  { %813 = vsyncpa [#allocation6], 1 }
 0x2fd   :  { %814 = vsyncpa [#allocation9], 1 }
 0x2fe   :  { %815 = vsyncpa [#allocation4], 1 }
 0x2ff   :  { %817 = vsyncpa [#allocation4 + $0x1], 1 }

</bundles_post_ra>
